<compile_context>
chip_gen: v7x
topology: tpu7x:2x2x1
jax: 0.10.0
libtpu: 0.0.40
codegen_flags: <defaults>
</compile_context>

<pallas_src>
import jax
import jax.numpy as jnp
from jax.experimental import pallas as pl
from jax.experimental.pallas import tpu as pltpu


def _cs_kernel(x_ref, w1t_ref, b1_ref, w2t_ref, b2_ref, o_ref):
    # Lane-dense layout: pixels on lanes, channels on sublanes.
    #   x_ref:   (C, tm)       w1t_ref: (hidden, C)   b1_ref: (hidden, 1)
    #   w2t_ref: (C, hidden)   b2_ref:  (C, 1)        o_ref:  (C, tm)
    x = x_ref[...].astype(jnp.float32)

    # conv1 (1x1) == channel matmul: (hidden, C) @ (C, tm) -> (hidden, tm)
    h = jnp.dot(w1t_ref[...], x, preferred_element_type=jnp.float32) + b1_ref[...]

    # Mish: h * tanh(softplus(h)) with PyTorch softplus threshold=20 semantics.
    # Rational rewrite: tanh(log1p(u)) = (u^2 + 2u) / (u^2 + 2u + 2), u = exp(h).
    u = jnp.exp(jnp.minimum(h, 20.0))
    num = u * (u + 2.0)
    tanh_sp = num / (num + 2.0)                 # exact divide (accuracy > approx recip)
    y = jnp.where(h > 20.0, h, h * tanh_sp)     # keep the threshold guard (do not remove)

    # conv2 (1x1) == channel matmul: (C, hidden) @ (hidden, tm) -> (C, tm)
    z = jnp.dot(w2t_ref[...], y, preferred_element_type=jnp.float32) + b2_ref[...]

    # sigmoid(z) = 0.5*(tanh(z/2)+1): one EUP op/element, exact, no clamps.
    y2 = 0.5 * (jnp.tanh(0.5 * z) + 1.0)

    o_ref[...] = (x * y2).astype(o_ref.dtype)


def _pick_tile(hw, tm_max):
    """Pixel-tile size: multiple of 128 (or the full dim when hw < 128), <= tm_max.

    The grid uses pl.cdiv, so tm does NOT need to divide hw; the ragged last
    block is masked on store (the op is purely per-pixel, so garbage lanes in
    the padded region are harmless).
    """
    tm_max = max(128, (tm_max // 128) * 128)
    if hw <= tm_max:
        if hw % 128 == 0:
            return hw          # whole pixel axis in one block per batch
        if hw < 128:
            return hw          # full-extent block (allowed even if <128)
        return (hw // 128) * 128
    return tm_max


def ywj_cs_layer(x, w1, b1, w2, b2, *, tm_max=16384):
    """x: (N, C, H, W) NCHW.  w1: (C, hidden), b1: (hidden,), w2: (hidden, C), b2: (C,)."""
    N, C, H, W = x.shape
    hidden = w1.shape[1]
    HW = H * W

    # NCHW stays put: (N, C, H, W) -> (N, C, H*W) is a free reshape (no transpose,
    # no HBM pad copy, no post-call slice).
    xr = x.reshape(N, C, HW)
    tm = _pick_tile(HW, tm_max)
    grid_m = pl.cdiv(HW, tm)

    # Tiny weight transposes so the kernel contracts channels on the sublane axis.
    w1t = jnp.transpose(w1)            # (hidden, C)
    w2t = jnp.transpose(w2)            # (C, hidden)
    b1r = b1.reshape(hidden, 1)
    b2r = b2.reshape(C, 1)

    out = pl.pallas_call(
        _cs_kernel,
        out_shape=jax.ShapeDtypeStruct((N, C, HW), x.dtype),
        grid_spec=pltpu.PrefetchScalarGridSpec(
            num_scalar_prefetch=0,
            grid=(N, grid_m),
            in_specs=[
                pl.BlockSpec((None, C, tm), lambda b, i: (b, 0, i)),
                pl.BlockSpec((hidden, C), lambda b, i: (0, 0)),
                pl.BlockSpec((hidden, 1), lambda b, i: (0, 0)),
                pl.BlockSpec((C, hidden), lambda b, i: (0, 0)),
                pl.BlockSpec((C, 1), lambda b, i: (0, 0)),
            ],
            out_specs=pl.BlockSpec((None, C, tm), lambda b, i: (b, 0, i)),
        ),
        compiler_params=pltpu.CompilerParams(
            dimension_semantics=("parallel", "parallel"),
            vmem_limit_bytes=32 * 1024 * 1024,
        ),
    )(xr, w1t, b1r, w2t, b2r)

    return out.reshape(N, C, H, W)


def _reference(x, w1, b1, w2, b2):
    # Pure-JAX reference of the PyTorch forward (for sanity check).
    xr = jnp.transpose(x, (0, 2, 3, 1)).astype(jnp.float32)
    h = xr @ w1 + b1
    sp = jnp.where(h > 20.0, h, jnp.log1p(jnp.exp(jnp.minimum(h, 20.0))))
    y = h * jnp.tanh(sp)
    z = y @ w2 + b2
    out = xr * jax.nn.sigmoid(z)
    return jnp.transpose(out, (0, 3, 1, 2)).astype(x.dtype)


if __name__ == "__main__":
    key = jax.random.PRNGKey(0)
    k_x, k_w1, k_b1, k_w2, k_b2 = jax.random.split(key, 5)

    N, C, H, W = 2, 4, 16, 16
    ratio = 3
    hidden = C * ratio

    x = jax.random.normal(k_x, (N, C, H, W), dtype=jnp.float32)

    # Conv2d(channel, channel*ratio, k=1): weight (out,in,1,1) -> matmul (in,out)
    w1 = jax.random.normal(k_w1, (C, hidden), dtype=jnp.float32) * 0.1
    b1 = jax.random.normal(k_b1, (hidden,), dtype=jnp.float32) * 0.1
    w2 = jax.random.normal(k_w2, (hidden, C), dtype=jnp.float32) * 0.1
    b2 = jax.random.normal(k_b2, (C,), dtype=jnp.float32) * 0.1

    out = ywj_cs_layer(x, w1, b1, w2, b2)
    out = jax.block_until_ready(out)

    ref = _reference(x, w1, b1, w2, b2)
    assert out.shape == (N, C, H, W)
    err = float(jnp.max(jnp.abs(out - ref)))
    assert jnp.allclose(out, ref, atol=2e-3, rtol=2e-3), err

    print("KERNEL_OK")
</pallas_src>

<mosaic_0001>
module attributes {stable_mosaic.version = 11 : i64} {
  func.func @_cs_kernel(%arg0: i32, %arg1: i32, %arg2: memref<1x4x256xf32, #tpu.memory_space<vmem>>, %arg3: memref<12x4xf32, #tpu.memory_space<vmem>>, %arg4: memref<12x1xf32, #tpu.memory_space<vmem>>, %arg5: memref<4x12xf32, #tpu.memory_space<vmem>>, %arg6: memref<4x1xf32, #tpu.memory_space<vmem>>, %arg7: memref<1x4x256xf32, #tpu.memory_space<vmem>>) attributes {dimension_semantics = [#tpu.dimension_semantics<parallel>, #tpu.dimension_semantics<parallel>], iteration_bounds = array<i64: 2, 1>, scalar_prefetch = 0 : i64, scratch_operands = 0 : i64, tpu.core_type = #tpu.core_type<tc>, window_params = [{transform_indices = @transform_0, window_bounds = array<i64: 1, 4, 256>}, {pipeline_mode = #tpu.pipeline_mode<synchronous>, transform_indices = @transform_1, window_bounds = array<i64: 12, 4>}, {pipeline_mode = #tpu.pipeline_mode<synchronous>, transform_indices = @transform_2, window_bounds = array<i64: 12, 1>}, {pipeline_mode = #tpu.pipeline_mode<synchronous>, transform_indices = @transform_3, window_bounds = array<i64: 4, 12>}, {pipeline_mode = #tpu.pipeline_mode<synchronous>, transform_indices = @transform_4, window_bounds = array<i64: 4, 1>}, {transform_indices = @transform_5, window_bounds = array<i64: 1, 4, 256>}]} {
    %c0 = arith.constant 0 : index
    %c0_0 = arith.constant 0 : index
    %c0_1 = arith.constant 0 : index
    %0 = vector.load %arg2[%c0, %c0_0, %c0_1] : memref<1x4x256xf32, #tpu.memory_space<vmem>>, vector<1x4x256xf32>
    %1 = vector.shape_cast %0 : vector<1x4x256xf32> to vector<4x256xf32>
    %c0_2 = arith.constant 0 : index
    %c0_3 = arith.constant 0 : index
    %2 = vector.load %arg3[%c0_2, %c0_3] : memref<12x4xf32, #tpu.memory_space<vmem>>, vector<12x4xf32>
    %cst = arith.constant dense<0.000000e+00> : vector<12x256xf32>
    %3 = tpu.matmul %2, %1, %cst {dimension_numbers = #tpu.dot_dimension_numbers<[1], [0], [0], [1], [0, 0, 1, 1], [], []>} : vector<12x4xf32>, vector<4x256xf32>, vector<12x256xf32> -> vector<12x256xf32>
    %c0_4 = arith.constant 0 : index
    %c0_5 = arith.constant 0 : index
    %4 = vector.load %arg4[%c0_4, %c0_5] : memref<12x1xf32, #tpu.memory_space<vmem>>, vector<12x1xf32>
    %5 = vector.broadcast %4 : vector<12x1xf32> to vector<12x256xf32>
    %6 = arith.addf %3, %5 : vector<12x256xf32>
    %cst_6 = arith.constant 2.000000e+01 : f32
    %7 = vector.broadcast %cst_6 : f32 to vector<12x256xf32>
    %8 = arith.minimumf %6, %7 : vector<12x256xf32>
    %9 = math.exp %8 : vector<12x256xf32>
    %cst_7 = arith.constant 2.000000e+00 : f32
    %10 = vector.broadcast %cst_7 : f32 to vector<12x256xf32>
    %11 = arith.addf %9, %10 : vector<12x256xf32>
    %12 = arith.mulf %9, %11 : vector<12x256xf32>
    %cst_8 = arith.constant 2.000000e+00 : f32
    %13 = vector.broadcast %cst_8 : f32 to vector<12x256xf32>
    %14 = arith.addf %12, %13 : vector<12x256xf32>
    %15 = arith.divf %12, %14 : vector<12x256xf32>
    %cst_9 = arith.constant 2.000000e+01 : f32
    %16 = vector.broadcast %cst_9 : f32 to vector<12x256xf32>
    %17 = arith.cmpf ogt, %6, %16 : vector<12x256xf32>
    %18 = arith.mulf %6, %15 : vector<12x256xf32>
    %19 = arith.select %17, %6, %18 : vector<12x256xi1>, vector<12x256xf32>
    %c0_10 = arith.constant 0 : index
    %c0_11 = arith.constant 0 : index
    %20 = vector.load %arg5[%c0_10, %c0_11] : memref<4x12xf32, #tpu.memory_space<vmem>>, vector<4x12xf32>
    %cst_12 = arith.constant dense<0.000000e+00> : vector<4x256xf32>
    %21 = tpu.matmul %20, %19, %cst_12 {dimension_numbers = #tpu.dot_dimension_numbers<[1], [0], [0], [1], [0, 0, 1, 1], [], []>} : vector<4x12xf32>, vector<12x256xf32>, vector<4x256xf32> -> vector<4x256xf32>
    %c0_13 = arith.constant 0 : index
    %c0_14 = arith.constant 0 : index
    %22 = vector.load %arg6[%c0_13, %c0_14] : memref<4x1xf32, #tpu.memory_space<vmem>>, vector<4x1xf32>
    %23 = vector.broadcast %22 : vector<4x1xf32> to vector<4x256xf32>
    %24 = arith.addf %21, %23 : vector<4x256xf32>
    %cst_15 = arith.constant 5.000000e-01 : f32
    %25 = vector.broadcast %cst_15 : f32 to vector<4x256xf32>
    %26 = arith.mulf %25, %24 : vector<4x256xf32>
    %27 = math.tanh %26 : vector<4x256xf32>
    %cst_16 = arith.constant 1.000000e+00 : f32
    %28 = vector.broadcast %cst_16 : f32 to vector<4x256xf32>
    %29 = arith.addf %27, %28 : vector<4x256xf32>
    %cst_17 = arith.constant 5.000000e-01 : f32
    %30 = vector.broadcast %cst_17 : f32 to vector<4x256xf32>
    %31 = arith.mulf %30, %29 : vector<4x256xf32>
    %32 = arith.mulf %1, %31 : vector<4x256xf32>
    %c0_18 = arith.constant 0 : index
    %c0_19 = arith.constant 0 : index
    %c0_20 = arith.constant 0 : index
    %33 = vector.load %arg7[%c0_18, %c0_19, %c0_20] : memref<1x4x256xf32, #tpu.memory_space<vmem>>, vector<1x4x256xf32>
    %34 = vector.shape_cast %33 : vector<1x4x256xf32> to vector<4x256xf32>
    %35 = vector.shape_cast %32 : vector<4x256xf32> to vector<1x4x256xf32>
    tpu.vector_store %arg7[%c0_18, %c0_19, %c0_20], %35 {strides = array<i32>} : memref<1x4x256xf32, #tpu.memory_space<vmem>>, vector<1x4x256xf32>,
    return
  }
  func.func @transform_0(%arg0: i32, %arg1: i32) -> (i32, i32, i32) {
    %c0_i32 = arith.constant 0 : i32
    %c0_i32_0 = arith.constant 0 : i32
    return %arg0, %c0_i32, %arg1 : i32, i32, i32
  }
  func.func @transform_1(%arg0: i32, %arg1: i32) -> (i32, i32) {
    %c0_i32 = arith.constant 0 : i32
    %c0_i32_0 = arith.constant 0 : i32
    %c0_i32_1 = arith.constant 0 : i32
    return %c0_i32, %c0_i32_0 : i32, i32
  }
  func.func @transform_2(%arg0: i32, %arg1: i32) -> (i32, i32) {
    %c0_i32 = arith.constant 0 : i32
    %c0_i32_0 = arith.constant 0 : i32
    %c0_i32_1 = arith.constant 0 : i32
    return %c0_i32, %c0_i32_0 : i32, i32
  }
  func.func @transform_3(%arg0: i32, %arg1: i32) -> (i32, i32) {
    %c0_i32 = arith.constant 0 : i32
    %c0_i32_0 = arith.constant 0 : i32
    %c0_i32_1 = arith.constant 0 : i32
    return %c0_i32, %c0_i32_0 : i32, i32
  }
  func.func @transform_4(%arg0: i32, %arg1: i32) -> (i32, i32) {
    %c0_i32 = arith.constant 0 : i32
    %c0_i32_0 = arith.constant 0 : i32
    %c0_i32_1 = arith.constant 0 : i32
    return %c0_i32, %c0_i32_0 : i32, i32
  }
  func.func @transform_5(%arg0: i32, %arg1: i32) -> (i32, i32, i32) {
    %c0_i32 = arith.constant 0 : i32
    %c0_i32_0 = arith.constant 0 : i32
    return %arg0, %c0_i32, %arg1 : i32, i32, i32
  }
}

</mosaic_0001>

<bundles_post_ra>
// kernel: tpu_custom_call.1
= control target key start
LH: loop header
LB: loop body
LE: loop exit
PB: predicated region body
PF: predicated region fallthrough
CT: control target
= control target key end

     0   :  { %10 = vsyncpa [#allocation3], 0  ;;  %s961_s0 = inlined_call_operand.vmem [shape: f32[2,4,256], index: 0, kind: input, shape index: {}]   ;;  %s962_s1 = inlined_call_operand.vmem [shape: f32[12,4], index: 1, kind: input, shape index: {}]   ;;  %s963_s2 = inlined_call_operand.vmem [shape: f32[12,1], index: 2, kind: input, shape index: {}]   ;;  %s964_s3 = inlined_call_operand.vmem [shape: f32[4,12], index: 3, kind: input, shape index: {}]   ;;  %s965_s4 = inlined_call_operand.vmem [shape: f32[4,1], index: 4, kind: input, shape index: {}]   ;;  %s966_s5 = inlined_call_operand.hbm [shape: f32[2,4,256], index: 5, kind: output, shape index: {}]  }
   0x1   :  { %12 = vsyncpa [#allocation3 + $0x1], 0  ;;  %s822_s18 = smov 0   ;;  %s824_s19 = smov 0  }
   0x2   :  { %s826_s20 = smov 0   ;;  %s828_s21 = smov 0  }
   0x3   :  { %s830_s22 = smov 0   ;;  %s832_s23 = smov 0  }
   0x4 LB: > { %s599_s24 = sadd.s32 4294967295, %s786_s23   ;;  %s600_s25 = sadd.s32 4294967294, %s786_s23   ;;  %s786_s23 = sphi %s832_s23, %s18_s23   ;;  %s782_s22 = sphi %s830_s22, %s973_s22   ;;  %s778_s21 = sphi %s828_s21, %s972_s21   ;;  %s774_s20 = sphi %s826_s20, %s971_s20   ;;  %s770_s19 = sphi %s824_s19, %s970_s19   ;;  %s766_s18 = sphi %s822_s18, %s969_s18  }
   0x5   : > { %s30_s26 = sadd.s32 1, %s782_s22  ;;  %s151_s27 = sadd.s32 1, %s774_s20 }
   0x6   : > { %p32_p0 = scmp.ge.s32.totalorder %s30_s26, 2  ;;  %p161_p1 = scmp.ne.s32.totalorder %s774_s20, %s770_s19 }
   0x7   : > { %p162_p2 = scmp.eq.s32.totalorder %s599_s24, 1  ;;  %p167_p3 = scmp.ne.s32.totalorder %s770_s19, %s766_s18 }
   0x8   : > { %s975_s26 = smov (%p32_p0, %s30_s26), 0  ;;  %p168_p5 = scmp.eq.s32.totalorder %s600_s25, 1 }
   0x9   : > { %p862_p4 = por %p162_p2, %p161_p1  ;;  %s146_s29 = ssub.s32 %s782_s22, %s975_s26 }
   0xa   : > { %p603_p6 = scmp.ge.s32.totalorder %s786_s23, 1  ;;  %p149_p7 = scmp.eq.s32.totalorder %s146_s29, 0 }
   0xb   : > { %p869_p8 = por %p168_p5, %p167_p3  ;;  %p211_p9 = scmp.lt.s32.totalorder %s786_s23, 3 }
   0xc   : > { %s875_s6 = scalar_select %p149_p7, %s774_s20, %s151_s27  }
   0xd   : > { %p212_p10 = pnand %p603_p6, %p211_p9 }
   0xe   : > { %p244_p11 = scmp.lt.s32.totalorder (!%p212_p10), %s778_s21, 1  ;;  %v788_v0 = vmov (!%p212_p10), 0.0   ;;  %v789_v1 = vmov (!%p212_p10), 0   ;;  %v257_v2 = vld [vmem:[%s963_s2] sm:$0xff] (!%p212_p10)  ;;  %v258_v3 = vld [vmem:[%s963_s2 + $0x8] sm:$0xf] (!%p212_p10) }
   0xf   : > { %215 = sbr.rel (%p212_p10) target bundleno = 543 (0x21f), region = 40  ;;  %347 = vmatprep.mubr.f32.mxu0 (!%p212_p10), %v788_v0  ;;  %685 = vset.pattern.permute.xlu0 (!%p212_p10), %v789_v1  ;;  %vm278_vm0 = vcmask (!%p212_p10), 1043456   ;;  %v255_v6 = vld [vmem:[%s962_s1] sm:$0xff] (!%p212_p10)  ;;  %vm271_vm1 = vcmask (!%p212_p10), 31744   ;;  %v256_v7 = vld [vmem:[%s962_s1 + $0x8] sm:$0xf] (!%p212_p10) }
  0x10   : > { %261 = vperm.xlu0 (!%p212_p10), %685, %v257_v2   ;;  %485 = vmatprep.mubr.f32.mxu1 (!%p212_p10), %v788_v0  ;;  %v405_v8 = vld [vmem:[%s965_s4] sm:$0xf] (!%p212_p10)  ;;  %vm790_vm6 = vmmov (!%p212_p10), 1   ;;  %vm411_vm8 = vcmask (!%p212_p10), 97280   ;;  %s620_s11 = sshll.u32 (!%p212_p10), %s778_s21, 7 }
  0x11   : > { %686 = vset.pattern.permute.xlu1 (!%p212_p10), %v789_v1  ;;  %vm622_vm7 = vmpackc.low (!%p212_p10), %vm278_vm0, %vm790_vm6  ;;  %v404_v61 = vld [vmem:[%s964_s3] sm:$0xf] (!%p212_p10)  ;;  %s914_s16 = scalar_lea.hbm (!%p212_p10), %s966_s5, %s620_s11 }
  0x12   : > { %408 = vperm.xlu1 (!%p212_p10), %686, %v405_v8  }
  0x14   : > { %266 = vperm.xlu0 (!%p212_p10), %685, %v258_v3  }
  0x16   : > { %s245_s9 = scalar_select %p244_p11, %s778_s21, 1 }
  0x17   : > { %s791_s21 = smov [#allocation2]  }
  0x18   : > { %s619_s12 = sshll.u32 %s245_s9, 3  ;;  %s240_s9 = sand.u32 1, %s770_s19  }
  0x19   : > { %s251_s15 = scalar_lea.vmem %s961_s0, %s619_s12  ;;  %s604_s10 = sshll.u32 %s240_s9, 3 }
  0x1a   : > { %v888_v4 = vld [vmem:[%s251_s15] sm:$0xff]  ;;  %s242_s12 = scalar_lea.vmem [#allocation2], %s604_s10  ;;  %s507_s17 = scalar_lea.sflag [#allocation3], %s240_s9 }
  0x1b   : > { %v270_v5 = vcombine.high %v888_v4, %v888_v4  ;;  %s523_s13 = sshll.u32 %s242_s12, 4  ;;  %s712_s25 = sshll.u32 %s791_s21, 4  ;;  %s916_s13 = int_to_ptr.vmem [resolvable:$true] %s523_s13  ;;  %s713_s25 = int_to_ptr.vmem [resolvable:$false] %s712_s25 }
  0x1c   : > { %s708_s24 = scalar_lea.vmem %s916_s13, 128  ;;  %s714_s27 = scalar_lea.vmem %s713_s25, 256 }
  0x1d   : > { %607 = vmatprep.subr.msk.mxu0 %vm278_vm0, %v270_v5  ;;  %p709_p12 = scmp.ne.s32.totalorder %s916_s13, %s708_s24  ;;  %p715_p1 = scmp.lt.s32.totalorder %s916_s13, %s713_s25 }
  0x1e   : > { %608 = vmatpush1.msk.msra.mxu0 %vm278_vm0, %v888_v4  ;;  %p716_p2 = scmp.lt.s32.totalorder %s714_s27, %s708_s24 }
  0x1f   : > { %609 = vmatmul.mubr.msk.f32.vlgmr.msra.gmra.mrb[0].mxu0 %vm271_vm1, %v255_v6  ;;  %p710_p13 = pnand %p709_p12, %p862_p4 }
  0x20   : > { %353 = vmatprep.mubr.f32.mxu0 %v788_v0  ;;  %p717_p3 = por %p716_p2, %p715_p1 }
  0x21   : > { %p711_p0 = pneg %p710_p13 }
  0x23   : > { %610 = vmatmul.mubr.msk.f32.gmra.mrb[2].mxu0 %vm271_vm1, %v256_v7  ;;  %p718_p5 = pnand %p717_p3, %p711_p0 }
  0x8f   : > { %v262_v9 = vpop.permute.xlu0 %261 }
  0x91   : > { %v409_v62 = vpop.permute.xlu1 %408 }
  0x93   : > { %v267_v15 = vpop.permute.xlu0 %266 }
  0xf2   : > { %v349_v10 = vpop.f32.mrb[0].mxu0 }
  0xf3   : > { %v350_v11 = vadd.f32 %v349_v10, %v262_v9  ;;  %v351_v12 = vpop.f32.mrb[1].mxu0 }
  0xf4   : > { %v352_v13 = vadd.f32 %v351_v12, %v262_v9 }
  0xf5   : > { %v360_v14 = vmin.f32 %v350_v11, 20.0  ;;  %vm392_vm2 = vcmp.gt.f32.partialorder %v350_v11, 20.0 }
  0xf6   : > { %v361_v16 = vmin.f32 %v352_v13, 20.0  ;;  %v355_v17 = vpop.f32.mrb[2].mxu0  ;;  %vm393_vm4 = vcmp.gt.f32.partialorder %v352_v13, 20.0 }
  0xf7   : > { %v364_v18 = vmul.f32 1.442695, %v360_v14  ;;  %v356_v19 = vadd.f32 %v355_v17, %v267_v15  ;;  %v357_v20 = vpop.f32.mrb[3].mxu0 }
  0xf8   : > { %v366_v21 = vmul.f32 1.442695, %v361_v16  ;;  %v358_v22 = vadd.f32 %v357_v20, %v267_v15 }
  0xf9   : > { %688 = vpow2.f32 %v364_v18  ;;  %v362_v23 = vmin.f32 %v356_v19, 20.0  ;;  %vm394_vm3 = vcmp.gt.f32.partialorder %v356_v19, 20.0 }
  0xfa   : > { %690 = vpow2.f32 %v366_v21  ;;  %v363_v24 = vmin.f32 %v358_v22, 20.0  ;;  %vm395_vm5 = vcmp.gt.f32.partialorder %v358_v22, 20.0 }
  0xfb   : > { %v368_v25 = vmul.f32 1.442695, %v362_v23 }
  0xfc   : > { %v370_v26 = vmul.f32 1.442695, %v363_v24 }
  0xfd   : > { %692 = vpow2.f32 %v368_v25 }
  0xfe   : > { %694 = vpow2.f32 %v370_v26 }
 0x103   : > { %v689_v27 = vpop.eup %688 }
 0x104   : > { %v691_v28 = vpop.eup %690  ;;  %v372_v29 = vadd.f32 2.0, %v689_v27 }
 0x105   : > { %v373_v30 = vadd.f32 2.0, %v691_v28 }
 0x106   : > { %v376_v31 = vmul.f32 %v689_v27, %v372_v29 }
 0x107   : > { %v693_v32 = vpop.eup %692  ;;  %v377_v33 = vmul.f32 %v691_v28, %v373_v30 }
 0x108   : > { %v695_v34 = vpop.eup %694  ;;  %v380_v35 = vadd.f32 2.0, %v376_v31  ;;  %v374_v36 = vadd.f32 2.0, %v693_v32 }
 0x109   : > { %v375_v37 = vadd.f32 2.0, %v695_v34  ;;  %v381_v38 = vadd.f32 2.0, %v377_v33 }
 0x10a   : > { %696 = vrcp.f32 %v380_v35  ;;  %v378_v39 = vmul.f32 %v693_v32, %v374_v36 }
 0x10b   : > { %v379_v40 = vmul.f32 %v695_v34, %v375_v37  ;;  %698 = vrcp.f32 %v381_v38 }
 0x10c   : > { %v382_v41 = vadd.f32 2.0, %v378_v39 }
 0x10d   : > { %v383_v42 = vadd.f32 2.0, %v379_v40 }
 0x10e   : > { %700 = vrcp.f32 %v382_v41 }
 0x10f   : > { %702 = vrcp.f32 %v383_v42 }
 0x114   : > { %v697_v43 = vpop.eup %696 }
 0x115   : > { %v699_v44 = vpop.eup %698  ;;  %v385_v45 = vmul.f32 %v697_v43, %v376_v31 }
 0x116   : > { %v387_v46 = vmul.f32 %v699_v44, %v377_v33 }
 0x117   : > { %v396_v49 = vmul.f32 %v385_v45, %v350_v11 }
 0x118   : > { %v701_v47 = vpop.eup %700  ;;  %v397_v52 = vmul.f32 %v387_v46, %v352_v13 }
 0x119   : > { %v703_v48 = vpop.eup %702  ;;  %v389_v50 = vmul.f32 %v701_v47, %v378_v39  ;;  %v400_v55 = vsel %vm392_vm2, %v350_v11, %v396_v49 }
 0x11a   : > { %v391_v51 = vmul.f32 %v703_v48, %v379_v40  ;;  %v401_v57 = vsel %vm393_vm4, %v352_v13, %v397_v52 }
 0x11b   : > { %v398_v53 = vmul.f32 %v389_v50, %v356_v19 }
 0x11c   : > { %v399_v54 = vmul.f32 %v391_v51, %v358_v22 }
 0x11d   : > { %v402_v56 = vsel %vm394_vm3, %v356_v19, %v398_v53 }
 0x11e   : > { %v403_v58 = vsel %vm395_vm5, %v358_v22, %v399_v54  ;;  %v624_v59 = vpack.c.bf16 %v402_v56, %v400_v55 }
 0x11f   : > { %v621_v60 = vpack.c.bf16 %v403_v58, %v401_v57 }
 0x121   : > { %623 = vmatprep.subr.msk.bf16.mxu1 %vm622_vm7, %v621_v60 }
 0x122   : > { %626 = vmatpush1.bf16.msk.msra.mxu1 %vm622_vm7, %v624_v59 }
 0x125   : > { %613 = vmatmul.mubr.msk.f32.vlgmr.msra.gmra.mrb[0].mxu1 %vm411_vm8, %v404_v61 }
 0x1f8   : > { %v487_v63 = vpop.f32.mrb[0].mxu1 }
 0x1f9   : > { %v488_v0 = vadd.f32 %v487_v63, %v409_v62  ;;  %v489_v1 = vpop.f32.mrb[1].mxu1 }
 0x1fa   : > { %v490_v2 = vadd.f32 %v489_v1, %v409_v62 }
 0x1fb   : > { %v492_v3 = vmul.f32 0.5, %v488_v0 }
 0x1fc   : > { %v493_v5 = vmul.f32 0.5, %v490_v2 }
 0x1fd   : > { %704 = vtanh.f32 %v492_v3 }
 0x1fe   : > { %706 = vtanh.f32 %v493_v5 }
 0x207   : > { %v705_v6 = vpop.eup %704 }
 0x208   : > { %v707_v7 = vpop.eup %706  ;;  %v496_v8 = vadd.f32 1.0, %v705_v6 }
 0x209   : > { %v497_v9 = vadd.f32 1.0, %v707_v7 }
 0x20a   : > { %v498_v10 = vmul.f32 0.5, %v496_v8 }
 0x20b   : > { %v499_v11 = vmul.f32 0.5, %v497_v9 }
 0x20d   : > { %v502_v12 = vcombine.low %v498_v10, %v499_v11 }
 0x20f   : > { %v504_v13 = vmul.f32 %v502_v12, %v888_v4 }
 0x211   : > { %505 = vst [vmem:[%s242_s12] sm:$0xff] %v504_v13 }
 0x212   : > { %721 = shalt.err (!%p718_p5)
}
 0x213   : > { %s722_s29 = scalar_lea.hbm %s914_s16, 128  ;;  %s726_s9 = scalar_lea.hbm %s966_s5, 256 }
 0x214   : > { %p723_p6 = scmp.ne.s32.totalorder %s914_s16, %s722_s29  ;;  %p727_p10 = scmp.lt.u32.totalorder %s914_s16, %s966_s5 }
 0x215   : > { %p728_p11 = scmp.lt.u32.totalorder %s726_s9, %s722_s29  ;;  %p730_p13 = scmp.lt.u32.totalorder %s722_s29, %s914_s16 }
 0x216   : > { %p724_p7 = pnand %p723_p6, %p862_p4 }
 0x217   : > { %p729_p12 = por %p728_p11, %p727_p10 }
 0x218   : > { %p725_p9 = pneg %p724_p7 }
 0x219   : > { %p731_p0 = por %p730_p13, %p729_p12 }
 0x21b   : > { %p732_p1 = pnand %p731_p0, %p725_p9 }
 0x21d   : > { %735 = shalt.err (!%p732_p1)
}
 0x21e   : > { %627 = dma.vmem_to_hbm [thread:$0]  (%p862_p4), %s916_s13, 128, %s914_s16, %s507_s17  }
 0x21f PF: > { %p633_p2 = scmp.ge.s32.totalorder %s786_s23, 2  ;;  %s535_s12 = sand.u32 1, %s766_s18  }
 0x220   : > { %s536_s14 = scalar_lea.sflag [#allocation3], %s535_s12 }
 0x221   : > { %p630_p3 = pnand %p633_p2, %p869_p8 }
 0x223   : > { %761 = dma.done.wait (!%p630_p3), %s536_s14, 128  }
 0x224   : > { %763 = vsyncadd (!%p630_p3), %s536_s14, 4294967168  ;;  %s18_s23 = sadd.s32 1, %s786_s23   ;;  %s969_s18 = smov %s770_s19 }
 0x225   : > { %p15_p5 = scmp.ge.s32.totalorder %s18_s23, 4   ;;  %s970_s19 = smov %s774_s20 }
 0x226   : > { %s971_s20 = smov %s875_s6  ;;  %s972_s21 = smov %s782_s22 }
 0x227   : > { %s973_s22 = smov %s975_s26  ;;  %17 = sbr.rel (!%p15_p5) target bundleno = 4 (0x4), region = 75 }
 0x22e   :  { %541 = vsyncpa [#allocation3], 1 }
 0x22f   :  { %543 = vsyncpa [#allocation3 + $0x1], 1 }

</bundles_post_ra>
